<compile_context>
chip_gen: v7x
topology: tpu7x:2x2x1
jax: 0.10.0
libtpu: 0.0.40
codegen_flags: <defaults>
</compile_context>

<pallas_src>
import functools

import jax
import jax.numpy as jnp
from jax.experimental import pallas as pl
from jax.experimental.pallas import tpu as pltpu


def _round_up(x: int, m: int) -> int:
    return ((x + m - 1) // m) * m


def _mase_kernel(ins_ref, fc_ref, tgt_ref, msk_ref, out_ref, *, freq, t_in, batch, tb):
    """One batch tile: writes this block's sum_b sum_t |tgt-fc| * mask / masep."""
    # masep = mean_t |ins[:, t+freq] - ins[:, t]|   (two statically offset slices
    # of the VMEM block; the lane-offset load is cheap XLU work, off the DMA path)
    a = ins_ref[:, pl.ds(freq, t_in - freq)].astype(jnp.float32)   # (tb, t_in-freq)
    b = ins_ref[:, pl.ds(0, t_in - freq)].astype(jnp.float32)
    masep = jnp.sum(jnp.abs(a - b), axis=1, keepdims=True) * jnp.float32(
        1.0 / (t_in - freq))                                        # (tb, 1)

    # divide_no_nan(mask, masep): masep == 0 (-> NaN or +inf ratios) maps to 0.
    safe = jnp.where(masep > 0.0, masep, jnp.float32(1.0))
    inv_masep = jnp.where(masep > 0.0, jnp.float32(1.0) / safe, jnp.float32(0.0))

    fc = fc_ref[...].astype(jnp.float32)                            # (tb, T_out)
    tgt = tgt_ref[...].astype(jnp.float32)
    msk = msk_ref[...].astype(jnp.float32)
    row_num = jnp.sum(jnp.abs(tgt - fc) * msk, axis=1, keepdims=True)  # (tb, 1)

    # Ragged last batch block: rows past the true batch end carry garbage (possibly
    # NaN/Inf), so gate with a select (not a multiply) to force exact zeros.
    row = jax.lax.broadcasted_iota(jnp.int32, (tb, 1), dimension=0)
    row_valid = (pl.program_id(0) * tb + row) < batch
    contrib = jnp.where(row_valid, row_num * inv_masep, jnp.float32(0.0))

    block_sum = jnp.sum(contrib)
    out_ref[...] = jnp.full(out_ref.shape, block_sum, dtype=jnp.float32)


def mase_loss(insample, freq, forecast, target, mask, *, block_rows=None):
    """insample: (B, T_in); freq: static int; forecast/target/mask: (B, T_out)."""
    insample = jnp.asarray(insample)
    forecast = jnp.asarray(forecast)
    target = jnp.asarray(target)
    mask = jnp.asarray(mask)

    B, T_in = insample.shape
    _, T_out = forecast.shape
    freq = int(freq)
    if not (0 < freq < T_in):
        raise ValueError(f"mase_loss requires 0 < freq < T_in, got freq={freq}, T_in={T_in}")

    # --- per-generation budgets (v7x: 64 MiB VMEM/TC; v5e/v6e: 128 MiB) ----------
    try:
        vmem_cap = int(pltpu.get_tpu_info().vmem_capacity_bytes)
    except Exception:  # pragma: no cover - conservative fallback
        vmem_cap = None
    if vmem_cap is not None and vmem_cap <= (64 << 20):
        step_budget, vmem_cap_limit = (4 << 20), (40 << 20)       # v7x-like
    elif vmem_cap is not None:
        step_budget, vmem_cap_limit = (8 << 20), (96 << 20)       # v5e / v6e
    else:
        step_budget, vmem_cap_limit = (6 << 20), (40 << 20)       # unknown: be safe

    # --- batch tile from TOTAL per-step input bytes -------------------------------
    row_bytes = (T_in * insample.dtype.itemsize
                 + T_out * (forecast.dtype.itemsize
                            + target.dtype.itemsize
                            + mask.dtype.itemsize))
    if block_rows is None:
        tb = step_budget // max(row_bytes, 1)
        tb = max(8, min((tb // 8) * 8, 1024))
    else:
        tb = max(8, _round_up(int(block_rows), 8))
    if B >= 16:
        # keep >= 2 grid steps so both v7x TensorCores get work on the parallel axis
        tb = min(tb, _round_up(pl.cdiv(B, 2), 8))
    tb = min(tb, B)          # full-dim block when B is small (no oversize blocks)
    num_blocks = pl.cdiv(B, tb)

    # --- VMEM budget: 2x double-buffered input blocks + f32 intermediates + slack --
    per_block_in = tb * row_bytes
    per_block_f32 = tb * (3 * T_in + 4 * T_out) * 4   # slices/upcasts/products
    vmem_limit = int(min(max(2 * per_block_in + per_block_f32 + (4 << 20), 16 << 20),
                         vmem_cap_limit))

    kernel = functools.partial(_mase_kernel, freq=freq, t_in=T_in, batch=B, tb=tb)

    partial = pl.pallas_call(
        kernel,
        out_shape=jax.ShapeDtypeStruct((num_blocks, 8, 128), jnp.float32),
        grid_spec=pltpu.PrefetchScalarGridSpec(
            num_scalar_prefetch=0,
            grid=(num_blocks,),
            in_specs=[
                pl.BlockSpec((tb, T_in), lambda i: (i, 0)),    # insample
                pl.BlockSpec((tb, T_out), lambda i: (i, 0)),   # forecast
                pl.BlockSpec((tb, T_out), lambda i: (i, 0)),   # target
                pl.BlockSpec((tb, T_out), lambda i: (i, 0)),   # mask
            ],
            out_specs=pl.BlockSpec((1, 8, 128), lambda i: (i, 0, 0)),
        ),
        compiler_params=pltpu.CompilerParams(
            dimension_semantics=("parallel",),
            vmem_limit_bytes=vmem_limit,
        ),
    )(insample, forecast, target, mask)

    # Every lane of each (8,128) partial holds the same block sum -> dense reduce.
    total = jnp.sum(partial) * jnp.float32(1.0 / (8 * 128))
    return total / jnp.float32(B * T_out)   # mean over the TRUE element count


def _mase_loss_ref(insample, freq, forecast, target, mask):
    # pure-JAX mirror of the torch module (for correctness checking)
    masep = jnp.mean(jnp.abs(insample[:, freq:] - insample[:, :-freq]), axis=1)
    ratio = mask / masep[:, None]
    ratio = jnp.where(jnp.isnan(ratio), 0.0, ratio)
    ratio = jnp.where(ratio == jnp.inf, 0.0, ratio)
    return jnp.mean(jnp.abs(target - forecast) * ratio)


if __name__ == "__main__":
    # --- small deterministic test (shapes implied by the module) -----------------
    B, T_in, T_out, FREQ = 2, 16, 8, 2
    key = jax.random.PRNGKey(0)
    k1, k2, k3, k4 = jax.random.split(key, 4)
    insample = jax.random.normal(k1, (B, T_in), dtype=jnp.float32)
    forecast = jax.random.normal(k2, (B, T_out), dtype=jnp.float32)
    target = jax.random.normal(k3, (B, T_out), dtype=jnp.float32)
    mask = (jax.random.uniform(k4, (B, T_out)) > 0.3).astype(jnp.float32)

    loss = mase_loss(insample, FREQ, forecast, target, mask)
    jax.block_until_ready(loss)
    ref = _mase_loss_ref(insample, FREQ, forecast, target, mask)
    assert jnp.allclose(loss, ref, rtol=1e-5, atol=1e-6), (loss, ref)

    # --- multi-block / ragged last block / divide_no_nan exercise ----------------
    B2, T_in2, T_out2, FREQ2 = 20, 300, 160, 2
    k5, k6, k7, k8 = jax.random.split(jax.random.PRNGKey(0), 4)
    ins2 = jax.random.normal(k5, (B2, T_in2), dtype=jnp.float32)
    ins2 = ins2.at[1].set(1.0)  # constant row -> masep == 0 -> divide_no_nan path
    fc2 = jax.random.normal(k6, (B2, T_out2), dtype=jnp.float32)
    tg2 = jax.random.normal(k7, (B2, T_out2), dtype=jnp.float32)
    mk2 = (jax.random.uniform(k8, (B2, T_out2)) > 0.3).astype(jnp.float32)

    loss2 = mase_loss(ins2, FREQ2, fc2, tg2, mk2, block_rows=8)  # 3 blocks, last ragged
    jax.block_until_ready(loss2)
    ref2 = _mase_loss_ref(ins2, FREQ2, fc2, tg2, mk2)
    assert jnp.allclose(loss2, ref2, rtol=1e-5, atol=1e-5), (loss2, ref2)

    # --- auto tile-size path (heuristic tb, single vs multi block) ---------------
    loss3 = mase_loss(ins2, FREQ2, fc2, tg2, mk2)
    jax.block_until_ready(loss3)
    assert jnp.allclose(loss3, ref2, rtol=1e-5, atol=1e-5), (loss3, ref2)

    print("KERNEL_OK")
</pallas_src>

<mosaic_0001>
module attributes {stable_mosaic.version = 11 : i64} {
  func.func @_mase_kernel(%arg0: i32, %arg1: memref<2x16xf32, #tpu.memory_space<vmem>>, %arg2: memref<2x8xf32, #tpu.memory_space<vmem>>, %arg3: memref<2x8xf32, #tpu.memory_space<vmem>>, %arg4: memref<2x8xf32, #tpu.memory_space<vmem>>, %arg5: memref<1x8x128xf32, #tpu.memory_space<vmem>>) attributes {dimension_semantics = [#tpu.dimension_semantics<parallel>], iteration_bounds = array<i64: 1>, scalar_prefetch = 0 : i64, scratch_operands = 0 : i64, tpu.core_type = #tpu.core_type<tc>, window_params = [{transform_indices = @transform_0, window_bounds = array<i64: 2, 16>}, {transform_indices = @transform_1, window_bounds = array<i64: 2, 8>}, {transform_indices = @transform_2, window_bounds = array<i64: 2, 8>}, {transform_indices = @transform_3, window_bounds = array<i64: 2, 8>}, {transform_indices = @transform_4, window_bounds = array<i64: 1, 8, 128>}]} {
    %c0 = arith.constant 0 : index
    %c2 = arith.constant 2 : index
    %0 = vector.load %arg1[%c0, %c2] : memref<2x16xf32, #tpu.memory_space<vmem>>, vector<2x14xf32>
    %c0_0 = arith.constant 0 : index
    %c0_1 = arith.constant 0 : index
    %1 = vector.load %arg1[%c0_0, %c0_1] : memref<2x16xf32, #tpu.memory_space<vmem>>, vector<2x14xf32>
    %2 = arith.subf %0, %1 : vector<2x14xf32>
    %3 = math.absf %2 : vector<2x14xf32>
    %cst = arith.constant dense<0.000000e+00> : vector<2xf32>
    %4 = vector.multi_reduction <add>, %3, %cst [1] : vector<2x14xf32> to vector<2xf32>
    %5 = vector.shape_cast %4 : vector<2xf32> to vector<2x1xf32>
    %cst_2 = arith.constant 0.0714285746 : f32
    %6 = vector.broadcast %cst_2 : f32 to vector<2x1xf32>
    %7 = arith.mulf %5, %6 : vector<2x1xf32>
    %cst_3 = arith.constant 0.000000e+00 : f32
    %8 = vector.broadcast %cst_3 : f32 to vector<2x1xf32>
    %9 = arith.cmpf ogt, %7, %8 : vector<2x1xf32>
    %cst_4 = arith.constant 1.000000e+00 : f32
    %10 = vector.broadcast %cst_4 : f32 to vector<2x1xf32>
    %11 = arith.select %9, %7, %10 : vector<2x1xi1>, vector<2x1xf32>
    %cst_5 = arith.constant 0.000000e+00 : f32
    %12 = vector.broadcast %cst_5 : f32 to vector<2x1xf32>
    %13 = arith.cmpf ogt, %7, %12 : vector<2x1xf32>
    %cst_6 = arith.constant 1.000000e+00 : f32
    %14 = vector.broadcast %cst_6 : f32 to vector<2x1xf32>
    %15 = arith.divf %14, %11 : vector<2x1xf32>
    %cst_7 = arith.constant 0.000000e+00 : f32
    %16 = vector.broadcast %cst_7 : f32 to vector<2x1xf32>
    %17 = arith.select %13, %15, %16 : vector<2x1xi1>, vector<2x1xf32>
    %c0_8 = arith.constant 0 : index
    %c0_9 = arith.constant 0 : index
    %18 = vector.load %arg2[%c0_8, %c0_9] : memref<2x8xf32, #tpu.memory_space<vmem>>, vector<2x8xf32>
    %c0_10 = arith.constant 0 : index
    %c0_11 = arith.constant 0 : index
    %19 = vector.load %arg3[%c0_10, %c0_11] : memref<2x8xf32, #tpu.memory_space<vmem>>, vector<2x8xf32>
    %c0_12 = arith.constant 0 : index
    %c0_13 = arith.constant 0 : index
    %20 = vector.load %arg4[%c0_12, %c0_13] : memref<2x8xf32, #tpu.memory_space<vmem>>, vector<2x8xf32>
    %21 = arith.subf %19, %18 : vector<2x8xf32>
    %22 = math.absf %21 : vector<2x8xf32>
    %23 = arith.mulf %22, %20 : vector<2x8xf32>
    %cst_14 = arith.constant dense<0.000000e+00> : vector<2xf32>
    %24 = vector.multi_reduction <add>, %23, %cst_14 [1] : vector<2x8xf32> to vector<2xf32>
    %25 = vector.shape_cast %24 : vector<2xf32> to vector<2x1xf32>
    %26 = tpu.iota {dimensions = array<i32: 0>} : vector<2x1xi32>
    %c2_i32 = arith.constant 2 : i32
    %27 = arith.muli %arg0, %c2_i32 : i32
    %28 = vector.broadcast %27 : i32 to vector<2x1xi32>
    %29 = arith.addi %28, %26 : vector<2x1xi32>
    %c2_i32_15 = arith.constant 2 : i32
    %30 = vector.broadcast %c2_i32_15 : i32 to vector<2x1xi32>
    %31 = arith.cmpi slt, %29, %30 : vector<2x1xi32>
    %32 = arith.mulf %25, %17 : vector<2x1xf32>
    %cst_16 = arith.constant 0.000000e+00 : f32
    %33 = vector.broadcast %cst_16 : f32 to vector<2x1xf32>
    %34 = arith.select %31, %32, %33 : vector<2x1xi1>, vector<2x1xf32>
    %35 = vector.shape_cast %34 : vector<2x1xf32> to vector<1x2x1xf32>
    %cst_17 = arith.constant dense<0.000000e+00> : vector<1xf32>
    %36 = vector.multi_reduction <add>, %35, %cst_17 [1, 2] : vector<1x2x1xf32> to vector<1xf32>
    %37 = vector.shape_cast %36 : vector<1xf32> to vector<1x1x1xf32>
    %38 = vector.extract %37[0, 0, 0] : f32 from vector<1x1x1xf32>
    %39 = vector.broadcast %38 : f32 to vector<1x8x128xf32>
    %c0_18 = arith.constant 0 : index
    %c0_19 = arith.constant 0 : index
    %c0_20 = arith.constant 0 : index
    %40 = vector.load %arg5[%c0_18, %c0_19, %c0_20] : memref<1x8x128xf32, #tpu.memory_space<vmem>>, vector<1x8x128xf32>
    tpu.vector_store %arg5[%c0_18, %c0_19, %c0_20], %39 {strides = array<i32>} : memref<1x8x128xf32, #tpu.memory_space<vmem>>, vector<1x8x128xf32>,
    return
  }
  func.func @transform_0(%arg0: i32) -> (i32, i32) {
    %c0_i32 = arith.constant 0 : i32
    %c0_i32_0 = arith.constant 0 : i32
    return %arg0, %c0_i32 : i32, i32
  }
  func.func @transform_1(%arg0: i32) -> (i32, i32) {
    %c0_i32 = arith.constant 0 : i32
    %c0_i32_0 = arith.constant 0 : i32
    return %arg0, %c0_i32 : i32, i32
  }
  func.func @transform_2(%arg0: i32) -> (i32, i32) {
    %c0_i32 = arith.constant 0 : i32
    %c0_i32_0 = arith.constant 0 : i32
    return %arg0, %c0_i32 : i32, i32
  }
  func.func @transform_3(%arg0: i32) -> (i32, i32) {
    %c0_i32 = arith.constant 0 : i32
    %c0_i32_0 = arith.constant 0 : i32
    return %arg0, %c0_i32 : i32, i32
  }
  func.func @transform_4(%arg0: i32) -> (i32, i32, i32) {
    %c0_i32 = arith.constant 0 : i32
    %c0_i32_0 = arith.constant 0 : i32
    %c0_i32_1 = arith.constant 0 : i32
    return %arg0, %c0_i32, %c0_i32_0 : i32, i32, i32
  }
}

</mosaic_0001>

<bundles_post_ra>
// kernel: tpu_custom_call.1
= control target key start
LH: loop header
LB: loop body
LE: loop exit
PB: predicated region body
PF: predicated region fallthrough
CT: control target
= control target key end

     0   :  { %9 = vsyncpa [#allocation3], 0  ;;  %s215_s0 = inlined_call_operand.hbm [shape: f32[2,16], index: 0, kind: input, shape index: {}]   ;;  %s216_s1 = inlined_call_operand.vmem [shape: f32[2,8], index: 1, kind: input, shape index: {}]   ;;  %s217_s2 = inlined_call_operand.vmem [shape: f32[2,8], index: 2, kind: input, shape index: {}]   ;;  %s218_s3 = inlined_call_operand.vmem [shape: f32[2,8], index: 3, kind: input, shape index: {}]   ;;  %s219_s4 = inlined_call_operand.hbm [shape: f32[1,8,128], index: 4, kind: output, shape index: {}]  }
   0x1   :  { %10 = vsyncpa [#allocation4], 0  ;;  %s153_s15 = smov [#allocation2]   ;;  %s105_s19 = scalar_lea.hbm %s215_s0, 32 }
   0x2   :  { %s17_s16 = sshll.u32 %s153_s15, 4  ;;  %p106_p0 = scmp.ne.s32.totalorder %s215_s0, %s105_s19  ;;  %s18_s16 = int_to_ptr.vmem [resolvable:$true] %s17_s16 }
   0x3   :  { %p109_p1 = scmp.lt.u32.totalorder %s105_s19, %s215_s0 }
   0x5   :  { %p111_p2 = pnand %p109_p1, %p106_p0 }
   0x7   :  { %114 = shalt.err (!%p111_p2)
}
   0x8   :  { %s115_s24 = scalar_lea.vmem %s18_s16, 32  ;;  %p120_p4 = scmp.lt.s32.totalorder %s18_s16, %s18_s16 }
   0x9   :  { %p116_p3 = scmp.ne.s32.totalorder %s18_s16, %s115_s24  ;;  %p121_p5 = scmp.lt.s32.totalorder %s115_s24, %s115_s24 }
   0xb   :  { %p122_p6 = por %p121_p5, %p120_p4 }
   0xd   :  { %p123_p7 = pnand %p122_p6, %p116_p3 }
   0xf   :  { %126 = shalt.err (!%p123_p7)
}
  0x10   :  { %20 = dma.hbm_to_vmem [thread:$0]  %s215_s0, 32, %s18_s16, [#allocation3]  }
  0x11   :  { %149 = dma.done.wait [#allocation3], 32  }
  0x12   :  { %150 = vsyncadd [#allocation3], 4294967264  ;;  %v30_v0 = vld [vmem:[#allocation2] sm:$0x3]  ;;  %s154_s27 = smov 2   ;;  %s155_s28 = smov 126   ;;  %v61_v16 = vlaneseq }
  0x13   :  { %32 = vrot.lane.b32.xlu0 %v30_v0, %s154_s27  ;;  %v51_v4 = vld [vmem:[%s216_s1] sm:$0x3]  ;;  %vm41_vm0 = vcmask 107520   ;;  %vm57_vm1 = vcmask 58368   ;;  %vm69_vm4 = vcmask 1024   ;;  %s156_s1 = smov [#allocation5]  }
  0x14   :  { %v52_v5 = vld [vmem:[%s217_s2] sm:$0x3]  ;;  %v62_v17 = vshrl.u32 %v61_v16, 7  ;;  %s88_s2 = sshll.u32 %s156_s1, 4  ;;  %s89_s2 = int_to_ptr.vmem [resolvable:$true] %s88_s2 }
  0x15   :  { %v54_v6 = vsub.f32 %v52_v5, %v51_v4  ;;  %v53_v8 = vld [vmem:[%s218_s3] sm:$0x3]  ;;  %s127_s8 = scalar_lea.vmem %s89_s2, 128  ;;  %p132_p9 = scmp.lt.s32.totalorder %s89_s2, %s89_s2 }
  0x16   :  { %vm66_vm3 = vcmp.lt.s32.totalorder %v62_v17, 2  ;;  %p128_p8 = scmp.ne.s32.totalorder %s89_s2, %s127_s8  ;;  %p133_p10 = scmp.lt.s32.totalorder %s127_s8, %s127_s8 }
  0x17   :  { %v55_v7 = vand.u32 2147483647, %v54_v6 }
  0x18   :  { %p134_p11 = por %p133_p10, %p132_p9 }
  0x19   :  { %v56_v9 = vmul.f32 %v55_v7, %v53_v8 }
  0x1a   :  { %p135_p12 = pnand %p134_p11, %p128_p8 }
  0x1b   :  { %v58_v12 = vsel %vm57_vm1, %v56_v9, 0.0 }
  0x85   :  { %v33_v1 = vpop.permute.xlu0 %32 }
  0x86   :  { %v35_v2 = vsub.f32 %v30_v0, %v33_v1 }
  0x88   :  { %v36_v3 = vand.u32 2147483647, %v35_v2 }
  0x8a   :  { %38 = vrot.lane.b32.xlu0 %v36_v3, %s155_s28 }
  0xfc   :  { %v39_v10 = vpop.permute.xlu0 %38 }
  0xfd   :  { %v42_v11 = vsel %vm41_vm0, %v39_v10, 0.0 }
  0xfe   :  { %43 = vadd.xlane.f32.xlu1 %v42_v11 }
 0x102   :  { %59 = vadd.xlane.f32.xlu1 %v58_v12 }
 0x18b   :  { %v44_v13 = vpop.xlane.xlu1 %43 }
 0x18c   :  { %v45_v14 = vmul.f32 0.071428575, %v44_v13 }
 0x18e   :  { %vm46_vm2 = vcmp.gt.f32.partialorder %v45_v14, 0.0 }
 0x18f   :  { %v47_v15 = vsel %vm46_vm2, %v45_v14, 1.0  ;;  %v60_v18 = vpop.xlane.xlu1 %59 }
 0x190   :  { %103 = vrcp.f32 %v47_v15 }
 0x19a   :  { %v104_v19 = vpop.eup %103 }
 0x19b   :  { %v50_v20 = vsel %vm46_vm2, %v104_v19, 0.0 }
 0x19c   :  { %v67_v21 = vmul.f32 %v60_v18, %v50_v20 }
 0x19e   :  { %v68_v22 = vsel %vm66_vm3, %v67_v21, 0.0 }
 0x19f   :  { %v70_v23 = vsel %vm69_vm4, %v68_v22, 0.0 }
 0x1a0   :  { %71 = vadd.xlane.f32.xlu0 %v70_v23 }
 0x22d   :  { %v72_v24 = vpop.xlane.xlu0 %71 }
 0x22e   :  { %v73_v25 = vrot.slane %v72_v24, 4 }
 0x230   :  { %v74_v26 = vadd.f32 %v73_v25, %v72_v24 }
 0x232   :  { %v75_v27 = vrot.slane %v74_v26, 2 }
 0x234   :  { %v76_v28 = vadd.f32 %v75_v27, %v74_v26 }
 0x236   :  { %v77_v29 = vrot.slane %v76_v28, 1 }
 0x238   :  { %v78_v30 = vadd.f32 %v77_v29, %v76_v28 }
 0x23a   :  { %97 = vpush %v78_v30 }
 0x26b   :  { %s98_s3 = spop %97 }
 0x26c   :  { %v80_v31 = vstv %s98_s3 }
 0x26d   :  { %81 = vst [vmem:[#allocation5] sm:$0xff] %v80_v31 }
 0x26e   :  { %138 = shalt.err (!%p135_p12)
}
 0x26f   :  { %s139_s11 = scalar_lea.hbm %s219_s4, 128 }
 0x270   :  { %p140_p13 = scmp.ne.s32.totalorder %s219_s4, %s139_s11  ;;  %p143_p0 = scmp.lt.u32.totalorder %s139_s11, %s219_s4 }
 0x272   :  { %p145_p1 = pnand %p143_p0, %p140_p13 }
 0x274   :  { %148 = shalt.err (!%p145_p1)
}
 0x275   :  { %91 = dma.vmem_to_hbm [thread:$0]  %s89_s2, 128, %s219_s4, [#allocation4]  }
 0x276   :  { %151 = dma.done.wait [#allocation4], 128  }
 0x277   :  { %152 = vsyncadd [#allocation4], 4294967168 }
 0x278   :  { %95 = vsyncpa [#allocation3], 1 }
 0x279   :  { %96 = vsyncpa [#allocation4], 1 }

</bundles_post_ra>
